<compile_context>
chip_gen: v7x
topology: tpu7x:2x2x1
jax: 0.10.0
libtpu: 0.0.40
codegen_flags: <defaults>
</compile_context>

<pallas_src>
import jax
import jax.numpy as jnp
import numpy as np
from jax.experimental import pallas as pl
from jax.experimental.pallas import tpu as pltpu

_LANE = 128
_SUBLANE = 8


def _channel_attention_kernel(x_ref, w1_ref, w2_ref, o_ref):
    x = x_ref[...]                                   # (bt, C, HW), input dtype
    hw = x.shape[-1]

    # ---- global average / max pool over spatial (lane) axis, f32 accumulate ----
    xf = x if x.dtype == jnp.float32 else x.astype(jnp.float32)
    avg = jnp.sum(xf, axis=-1) * (1.0 / hw)          # (bt, C) f32
    mx = jnp.max(xf, axis=-1)                        # (bt, C) f32

    # ---- shared MLP; second matmul shared via linearity of the last Linear ----
    w1 = w1_ref[...].astype(jnp.float32)             # (C, hidden)
    w2 = w2_ref[...].astype(jnp.float32)             # (hidden, C)
    h = (jnp.maximum(jnp.dot(avg, w1, preferred_element_type=jnp.float32), 0.0)
         + jnp.maximum(jnp.dot(mx, w1, preferred_element_type=jnp.float32), 0.0))
    out = jnp.dot(h, w2, preferred_element_type=jnp.float32)   # (bt, C) f32

    scale = jax.nn.sigmoid(out)                      # (bt, C) f32

    # ---- apply channel-wise scale (reuse the already-loaded x) ----
    o_ref[...] = (x * scale[:, :, None].astype(x.dtype)).astype(o_ref.dtype)


def channel_attention(x_nchw, w1, w2):
    """x: (B, C, H, W);  w1 = fc1.weight.T (C, C//r);  w2 = fc2.weight.T (C//r, C)."""
    b, c, h, w = x_nchw.shape
    hw = h * w
    hidden = w1.shape[1]
    itemsize = x_nchw.dtype.itemsize

    # Row-major merge of the last two dims: free metadata change, no HBM pass.
    x_flat = x_nchw.reshape(b, c, hw)

    # --- VMEM accounting (physical (8,128)-tile padded sizes) ---
    cp = ((c + _SUBLANE - 1) // _SUBLANE) * _SUBLANE
    hwp = ((hw + _LANE - 1) // _LANE) * _LANE
    per_sample_io = cp * hwp * itemsize              # one (1,C,HW) block, I/O dtype
    per_sample_f32 = cp * hwp * 4                    # one block-sized f32 temporary

    def _wpad(r, cdim):
        return (((r + _SUBLANE - 1) // _SUBLANE) * _SUBLANE
                * ((cdim + _LANE - 1) // _LANE) * _LANE * 4)
    weight_bytes = _wpad(c, hidden) + _wpad(hidden, c)   # resident (grid-invariant)

    def per_step_bytes(bt):
        # 2x double-buffered input + 2x output blocks + ~3 block-sized in-kernel
        # f32 temporaries (cast / product before store) + resident weights.
        return 4 * bt * per_sample_io + 3 * bt * per_sample_f32 + weight_bytes

    # --- hardware-aware VMEM budget ---
    try:
        vmem_cap = int(pltpu.get_tpu_info().vmem_capacity_bytes)
    except Exception:
        vmem_cap = 64 << 20                          # conservative: v7x per-core VMEM
    budget = min(int(0.30 * vmem_cap), 24 << 20)

    # --- batch tile: largest divisor of B keeping >= min(4, B) grid steps and
    # fitting the budget; >= 2 steps also lets v7x shard the grid across its TCs.
    min_steps = min(4, b)
    bt = 1
    for cand in range(1, b + 1):
        if b % cand:
            continue
        if b // cand < min_steps:
            break
        if per_step_bytes(cand) <= budget:
            bt = cand

    per_step = per_step_bytes(bt)
    if per_step > int(0.9 * vmem_cap):
        raise ValueError(
            f"ChannelAttention block too large for VMEM: per-step footprint "
            f"{per_step} B exceeds 90% of capacity {vmem_cap} B (C={c}, HW={hw}).")
    vmem_limit = int(min(max(per_step + (8 << 20), 16 << 20), int(0.9 * vmem_cap)))

    # Advisory cost estimate: the kernel is HBM-bound (read + write of x).
    cost = pl.CostEstimate(
        flops=int(2 * b * c * hw + 3 * 2 * b * c * hidden),
        transcendentals=int(b * c),                  # sigmoid
        bytes_accessed=int(2 * b * c * hw * itemsize + (2 * c * hidden) * 4),
    )

    out_flat = pl.pallas_call(
        _channel_attention_kernel,
        out_shape=jax.ShapeDtypeStruct((b, c, hw), x_nchw.dtype),
        grid=(b // bt,),
        in_specs=[
            pl.BlockSpec((bt, c, hw), lambda i: (i, 0, 0)),   # x: streamed per batch tile
            pl.BlockSpec((c, hidden), lambda i: (0, 0)),      # w1: grid-invariant (resident)
            pl.BlockSpec((hidden, c), lambda i: (0, 0)),      # w2: grid-invariant (resident)
        ],
        out_specs=pl.BlockSpec((bt, c, hw), lambda i: (i, 0, 0)),
        compiler_params=pltpu.CompilerParams(
            dimension_semantics=("parallel",),   # megacore sharding on v7x; harmless elsewhere
            vmem_limit_bytes=vmem_limit,
        ),
        cost_estimate=cost,
    )(x_flat, w1, w2)

    return out_flat.reshape(b, c, h, w)


def channel_attention_ref(x_nchw, w1, w2):
    b, c, h, w = x_nchw.shape
    xf = x_nchw.astype(jnp.float32)
    x_flat = xf.reshape(b, c, h * w)
    avg = jnp.mean(x_flat, axis=-1)
    mx = jnp.max(x_flat, axis=-1)

    def mlp(v):
        return jnp.maximum(v @ w1.astype(jnp.float32), 0.0) @ w2.astype(jnp.float32)

    scale = jax.nn.sigmoid(mlp(avg) + mlp(mx))
    return xf * scale[:, :, None, None]


if __name__ == "__main__":
    RATIO = 16

    # ---- main check: ChannelAttention(in_planes=64, ratio=16), HW = 256 ----
    B, C, H, W = 2, 64, 16, 16
    HIDDEN = C // RATIO
    kx, k1, k2 = jax.random.split(jax.random.PRNGKey(0), 3)
    x = jax.random.normal(kx, (B, C, H, W), dtype=jnp.float32)
    w1 = jax.random.normal(k1, (C, HIDDEN), dtype=jnp.float32) * (1.0 / np.sqrt(C))
    w2 = jax.random.normal(k2, (HIDDEN, C), dtype=jnp.float32) * (1.0 / np.sqrt(HIDDEN))
    out = jax.block_until_ready(channel_attention(x, w1, w2))
    ref = channel_attention_ref(x, w1, w2)
    np.testing.assert_allclose(np.asarray(out), np.asarray(ref), rtol=1e-5, atol=1e-5)

    # ---- secondary check: HW = 100 (not a multiple of 128), no padding path ----
    B2, C2, H2, W2 = 3, 32, 10, 10
    HID2 = C2 // RATIO
    k3, k4, k5 = jax.random.split(jax.random.PRNGKey(1), 3)
    x2 = jax.random.normal(k3, (B2, C2, H2, W2), dtype=jnp.float32)
    w1b = jax.random.normal(k4, (C2, HID2), dtype=jnp.float32) * (1.0 / np.sqrt(C2))
    w2b = jax.random.normal(k5, (HID2, C2), dtype=jnp.float32) * (1.0 / np.sqrt(HID2))
    out2 = jax.block_until_ready(channel_attention(x2, w1b, w2b))
    ref2 = channel_attention_ref(x2, w1b, w2b)
    np.testing.assert_allclose(np.asarray(out2), np.asarray(ref2), rtol=1e-5, atol=1e-5)

    # ---- bf16 activation path: HW = 196 (ResNet-like, non-128-multiple) ----
    B3, C3, H3, W3 = 4, 64, 14, 14
    HID3 = C3 // RATIO
    k6, k7, k8 = jax.random.split(jax.random.PRNGKey(2), 3)
    x3 = jax.random.normal(k6, (B3, C3, H3, W3), dtype=jnp.float32).astype(jnp.bfloat16)
    w1c = (jax.random.normal(k7, (C3, HID3), dtype=jnp.float32) * (1.0 / np.sqrt(C3)))
    w2c = (jax.random.normal(k8, (HID3, C3), dtype=jnp.float32) * (1.0 / np.sqrt(HID3)))
    out3 = jax.block_until_ready(channel_attention(x3, w1c, w2c))
    ref3 = channel_attention_ref(x3, w1c, w2c)
    np.testing.assert_allclose(np.asarray(out3, dtype=np.float32), np.asarray(ref3),
                               rtol=5e-2, atol=5e-2)

    print("KERNEL_OK")
</pallas_src>

<mosaic_0001>
module attributes {stable_mosaic.version = 11 : i64} {
  func.func @_channel_attention_kernel(%arg0: i32, %arg1: memref<1x64x256xf32, #tpu.memory_space<vmem>>, %arg2: memref<64x4xf32, #tpu.memory_space<vmem>>, %arg3: memref<4x64xf32, #tpu.memory_space<vmem>>, %arg4: memref<1x64x256xf32, #tpu.memory_space<vmem>>) attributes {dimension_semantics = [#tpu.dimension_semantics<parallel>], iteration_bounds = array<i64: 2>, scalar_prefetch = 0 : i64, scratch_operands = 0 : i64, tpu.core_type = #tpu.core_type<tc>, window_params = [{transform_indices = @transform_0, window_bounds = array<i64: 1, 64, 256>}, {pipeline_mode = #tpu.pipeline_mode<synchronous>, transform_indices = @transform_1, window_bounds = array<i64: 64, 4>}, {pipeline_mode = #tpu.pipeline_mode<synchronous>, transform_indices = @transform_2, window_bounds = array<i64: 4, 64>}, {transform_indices = @transform_3, window_bounds = array<i64: 1, 64, 256>}]} {
    %c0 = arith.constant 0 : index
    %c0_0 = arith.constant 0 : index
    %c0_1 = arith.constant 0 : index
    %0 = vector.load %arg1[%c0, %c0_0, %c0_1] : memref<1x64x256xf32, #tpu.memory_space<vmem>>, vector<1x64x256xf32>
    %cst = arith.constant dense<0.000000e+00> : vector<1x64xf32>
    %1 = vector.multi_reduction <add>, %0, %cst [2] : vector<1x64x256xf32> to vector<1x64xf32>
    %cst_2 = arith.constant 3.906250e-03 : f32
    %2 = vector.broadcast %cst_2 : f32 to vector<1x64xf32>
    %3 = arith.mulf %1, %2 : vector<1x64xf32>
    %cst_3 = arith.constant dense<0xFF800000> : vector<1x64xf32>
    %4 = vector.multi_reduction <maximumf>, %0, %cst_3 [2] : vector<1x64x256xf32> to vector<1x64xf32>
    %c0_4 = arith.constant 0 : index
    %c0_5 = arith.constant 0 : index
    %5 = vector.load %arg2[%c0_4, %c0_5] : memref<64x4xf32, #tpu.memory_space<vmem>>, vector<64x4xf32>
    %c0_6 = arith.constant 0 : index
    %c0_7 = arith.constant 0 : index
    %6 = vector.load %arg3[%c0_6, %c0_7] : memref<4x64xf32, #tpu.memory_space<vmem>>, vector<4x64xf32>
    %cst_8 = arith.constant dense<0.000000e+00> : vector<1x4xf32>
    %7 = tpu.matmul %3, %5, %cst_8 {dimension_numbers = #tpu.dot_dimension_numbers<[1], [0], [0], [1], [0, 0, 1, 1], [], []>} : vector<1x64xf32>, vector<64x4xf32>, vector<1x4xf32> -> vector<1x4xf32>
    %cst_9 = arith.constant 0.000000e+00 : f32
    %8 = vector.broadcast %cst_9 : f32 to vector<1x4xf32>
    %9 = arith.maximumf %7, %8 : vector<1x4xf32>
    %cst_10 = arith.constant dense<0.000000e+00> : vector<1x4xf32>
    %10 = tpu.matmul %4, %5, %cst_10 {dimension_numbers = #tpu.dot_dimension_numbers<[1], [0], [0], [1], [0, 0, 1, 1], [], []>} : vector<1x64xf32>, vector<64x4xf32>, vector<1x4xf32> -> vector<1x4xf32>
    %cst_11 = arith.constant 0.000000e+00 : f32
    %11 = vector.broadcast %cst_11 : f32 to vector<1x4xf32>
    %12 = arith.maximumf %10, %11 : vector<1x4xf32>
    %13 = arith.addf %9, %12 : vector<1x4xf32>
    %cst_12 = arith.constant dense<0.000000e+00> : vector<1x64xf32>
    %14 = tpu.matmul %13, %6, %cst_12 {dimension_numbers = #tpu.dot_dimension_numbers<[1], [0], [0], [1], [0, 0, 1, 1], [], []>} : vector<1x4xf32>, vector<4x64xf32>, vector<1x64xf32> -> vector<1x64xf32>
    %15 = arith.negf %14 : vector<1x64xf32>
    %16 = math.exp %15 : vector<1x64xf32>
    %cst_13 = arith.constant 1.000000e+00 : f32
    %17 = vector.broadcast %cst_13 : f32 to vector<1x64xf32>
    %18 = arith.addf %17, %16 : vector<1x64xf32>
    %19 = arith.divf %17, %18 : vector<1x64xf32>
    %20 = vector.shape_cast %19 : vector<1x64xf32> to vector<1x64x1xf32>
    %21 = vector.broadcast %20 : vector<1x64x1xf32> to vector<1x64x256xf32>
    %22 = arith.mulf %0, %21 : vector<1x64x256xf32>
    %c0_14 = arith.constant 0 : index
    %c0_15 = arith.constant 0 : index
    %c0_16 = arith.constant 0 : index
    %23 = vector.load %arg4[%c0_14, %c0_15, %c0_16] : memref<1x64x256xf32, #tpu.memory_space<vmem>>, vector<1x64x256xf32>
    tpu.vector_store %arg4[%c0_14, %c0_15, %c0_16], %22 {strides = array<i32>} : memref<1x64x256xf32, #tpu.memory_space<vmem>>, vector<1x64x256xf32>,
    return
  }
  func.func @transform_0(%arg0: i32) -> (i32, i32, i32) {
    %c0_i32 = arith.constant 0 : i32
    %c0_i32_0 = arith.constant 0 : i32
    %c0_i32_1 = arith.constant 0 : i32
    return %arg0, %c0_i32, %c0_i32_0 : i32, i32, i32
  }
  func.func @transform_1(%arg0: i32) -> (i32, i32) {
    %c0_i32 = arith.constant 0 : i32
    %c0_i32_0 = arith.constant 0 : i32
    %c0_i32_1 = arith.constant 0 : i32
    return %c0_i32, %c0_i32_0 : i32, i32
  }
  func.func @transform_2(%arg0: i32) -> (i32, i32) {
    %c0_i32 = arith.constant 0 : i32
    %c0_i32_0 = arith.constant 0 : i32
    %c0_i32_1 = arith.constant 0 : i32
    return %c0_i32, %c0_i32_0 : i32, i32
  }
  func.func @transform_3(%arg0: i32) -> (i32, i32, i32) {
    %c0_i32 = arith.constant 0 : i32
    %c0_i32_0 = arith.constant 0 : i32
    %c0_i32_1 = arith.constant 0 : i32
    return %arg0, %c0_i32, %c0_i32_0 : i32, i32, i32
  }
}

</mosaic_0001>

<bundles_post_ra>
// kernel: tpu_custom_call.1
= control target key start
LH: loop header
LB: loop body
LE: loop exit
PB: predicated region body
PF: predicated region fallthrough
CT: control target
= control target key end

     0   :  { %8 = vsyncpa [#allocation3], 0  ;;  %s1400_s0 = inlined_call_operand.hbm [shape: f32[2,64,256], index: 0, kind: input, shape index: {}]   ;;  %s1401_s1 = inlined_call_operand.vmem [shape: f32[64,4], index: 1, kind: input, shape index: {}]   ;;  %s1402_s2 = inlined_call_operand.vmem [shape: f32[4,64], index: 2, kind: input, shape index: {}]   ;;  %s1403_s3 = inlined_call_operand.hbm [shape: f32[2,64,256], index: 3, kind: output, shape index: {}]  }
   0x1   :  { %10 = vsyncpa [#allocation3 + $0x1], 0 }
   0x2   :  { %11 = vsyncpa [#allocation4], 0 }
   0x3   :  { %13 = vsyncpa [#allocation4 + $0x1], 0  ;;  %s1058_s12 = smov 0   ;;  %s1060_s13 = smov 0  }
   0x4   :  { %s1062_s14 = smov 0   ;;  %s1064_s15 = smov 0  }
   0x5 LB: > { %s1079_s16 = sadd.s32 4294967295, %s1027_s15   ;;  %s766_s17 = sadd.s32 4294967294, %s1027_s15   ;;  %s1027_s15 = sphi %s1064_s15, %s1416_s15   ;;  %s1023_s14 = sphi %s1062_s14, %s1415_s14   ;;  %s1019_s13 = sphi %s1060_s13, %s1414_s13   ;;  %s1015_s12 = sphi %s1058_s12, %s1413_s12  }
   0x6   : > { %s1083_s18 = sadd.s32 1, %s1027_s15   ;;  %s26_s19 = sadd.s32 1, %s1023_s14 }
   0x7   : > { %s23_s20 = ssub.s32 %s1027_s15, %s1083_s18  ;;  %p33_p0 = scmp.ne.s32.totalorder %s1023_s14, %s1019_s13 }
   0x8   : > { %p24_p1 = scmp.eq.s32.totalorder %s23_s20, 0  ;;  %p34_p2 = scmp.eq.s32.totalorder %s1027_s15, 0 }
   0x9   : > { %p39_p3 = scmp.ne.s32.totalorder %s1019_s13, %s1015_s12  ;;  %p40_p4 = scmp.eq.s32.totalorder %s1079_s16, 0 }
   0xa   : > { %s1095_s21 = scalar_select %p24_p1, %s1023_s14, %s26_s19  }
   0xb   : > { %p1097_p5 = por %p34_p2, %p33_p0  ;;  %p1101_p6 = por %p40_p4, %p39_p3 }
   0xc   : > { %p105_p7 = scmp.eq.s32.totalorder %s1079_s16, 1  ;;  %p111_p8 = scmp.eq.s32.totalorder %s766_s17, 1 }
   0xd   : > { %p886_p10 = scmp.lt.s32.totalorder %s1027_s15, 2  ;;  %s137_s26 = sand.u32 1, %s1023_s14  }
   0xe   : > { %p1108_p11 = por %p105_p7, %p33_p0  ;;  %p1112_p12 = por %p111_p8, %p39_p3 }
   0xf   : > { %s785_s27 = sshll.u32 %s1027_s15, 11  ;;  %s769_s28 = sshll.u32 %s137_s26, 7 }
  0x10   : > { %s1407_s24 = scalar_select %p1108_p11, 1, 0 }
  0x11   : > { %s1408_s25 = scalar_select %p1112_p12, 1, 0 }
  0x12   : > { %s1121_s4 = scalar_lea.hbm %s1400_s0, %s785_s27  ;;  %s141_s5 = scalar_lea.vmem [#allocation2], %s769_s28 }
  0x13   : > { %s148_s6 = sshll.u32 %s141_s5, 4  ;;  %p1125_p13 = pnand %p886_p10, %p1097_p5  ;;  %s1129_s6 = int_to_ptr.vmem [resolvable:$true] %s148_s6 }
  0x14   : > { %s1131_s8 = scalar_lea.sflag [#allocation3], %s137_s26  ;;  %s931_s9 = scalar_lea.hbm %s1121_s4, 2048 }
  0x15   : > { %p932_p0 = scmp.ne.s32.totalorder %s1121_s4, %s931_s9  ;;  %p933_p1 = pneg %p1125_p13 }
  0x16   : > { %s936_s17 = scalar_lea.hbm %s1400_s0, 4096  ;;  %p937_p4 = scmp.lt.u32.totalorder %s1121_s4, %s1400_s0 }
  0x17   : > { %p934_p2 = pnand %p933_p1, %p932_p0  ;;  %p938_p5 = scmp.lt.u32.totalorder %s936_s17, %s931_s9 }
  0x18   : > { %p940_p8 = scmp.lt.u32.totalorder %s931_s9, %s1121_s4 }
  0x19   : > { %p935_p3 = pneg %p934_p2  ;;  %p939_p7 = por %p938_p5, %p937_p4 }
  0x1b   : > { %p941_p10 = por %p940_p8, %p939_p7 }
  0x1d   : > { %p942_p9 = pnand %p941_p10, %p935_p3 }
  0x1f   : > { %945 = shalt.err (!%p942_p9)
}
  0x20   : > { %s946_s22 = scalar_lea.vmem %s1129_s6, 2048  ;;  %s1029_s26 = smov [#allocation2]  }
  0x21   : > { %p947_p0 = scmp.ne.s32.totalorder %s1129_s6, %s946_s22  ;;  %s951_s27 = sshll.u32 %s1029_s26, 4  ;;  %s952_s27 = int_to_ptr.vmem [resolvable:$false] %s951_s27 }
  0x22   : > { %s953_s28 = scalar_lea.vmem %s952_s27, 4096  ;;  %p954_p11 = scmp.lt.s32.totalorder %s1129_s6, %s952_s27 }
  0x23   : > { %p949_p2 = pnand %p947_p0, %p933_p1  ;;  %p955_p4 = scmp.lt.s32.totalorder %s953_s28, %s946_s22 }
  0x25   : > { %p950_p12 = pneg %p949_p2  ;;  %p956_p5 = por %p955_p4, %p954_p11 }
  0x27   : > { %p957_p7 = pnand %p956_p5, %p950_p12 }
  0x29   : > { %960 = shalt.err (!%p957_p7)
}
  0x2a   : > { %s1030_s29 = smov 256   ;;  %s1031_s30 = smov 16  }
  0x2b   : > { %881 = dma.hbm_to_vmem [thread:$0]  (!%p1125_p13), %s1121_s4, 2048, %s1129_s6, %s1131_s8, %s1030_s29, %s1030_s29, %s1031_s30  }
  0x2c   : > { %p772_p9 = scmp.ge.s32.totalorder %s1027_s15, 1  ;;  %p156_p1 = scmp.lt.s32.totalorder %s1027_s15, 3 }
  0x2e   : > { %p157_p3 = pnand %p772_p9, %p156_p1 }
  0x2f   : > { %s1162_s5 = sand.u32 (!%p157_p3), 1, %s1019_s13  }
  0x30   : > { %160 = sbr.rel (%p157_p3) target bundleno = 838 (0x346), region = 32  ;;  %s773_s9 = sshll.u32 (!%p157_p3), %s1162_s5, 7 }
  0x31   : > { %s163_s10 = scalar_lea.sflag (!%p157_p3), [#allocation3], %s1162_s5  ;;  %s1168_s11 = scalar_lea.vmem (!%p157_p3), [#allocation2], %s773_s9 }
  0x37   : > { %1006 = dma.done.wait (%p1101_p6), %s163_s10, 2048  }
  0x38   : > { %1008 = vsyncadd (%p1101_p6), %s163_s10, 4294965248  ;;  %v1175_v0 = vld [vmem:[%s1168_s11 + $0x20] sm:$0xff]  ;;  %v1178_v1 = vld [vmem:[%s1168_s11 + $0x28] sm:$0xff]  ;;  %v1032_v35 = vmov 0.0|0.0   ;;  %vm1033_vm0 = vmmov 0   ;;  %v1034_v45 = vmov 0.0   ;;  %v278_v48 = vlaneseq }
  0x39   : > { %v1181_v2 = vld [vmem:[%s1168_s11] sm:$0xff]  ;;  %v211_v3 = vadd.f32 %v1178_v1, %v1175_v0  ;;  %v1186_v4 = vld [vmem:[%s1168_s11 + $0x8] sm:$0xff]  ;;  %v1189_v5 = vld [vmem:[%s1168_s11 + $0x30] sm:$0xff]  ;;  %v243_v16 = vmax.f32 %v1175_v0, %v1178_v1  ;;  %850 = vmatprep.subr.bf16.mxu0 %v1032_v35  ;;  %862 = vmatprep.subr.bf16.mxu1 %v1032_v35  ;;  %vm289_vm1 = vcmask 130112   ;;  %vm296_vm2 = vcmask 195712   ;;  %s1319_s6 = scalar_lea.vmem [#allocation5], %s773_s9 }
  0x3a   : > { %v1192_v6 = vld [vmem:[%s1168_s11 + $0x38] sm:$0xff]  ;;  %v205_v7 = vadd.f32 %v1186_v4, %v1181_v2  ;;  %v1197_v8 = vld [vmem:[%s1168_s11 + $0x10] sm:$0xff]  ;;  %v237_v13 = vmax.f32 %v1181_v2, %v1186_v4  ;;  %v1211_v14 = vld [vmem:[%s1168_s11 + $0x40] sm:$0xff]  ;;  %823 = vmatprep.mubr.msk.f32.mxu0 %vm1033_vm0, %v1034_v45  ;;  %842 = vmatprep.mubr.msk.f32.mxu1 %vm1033_vm0, %v1034_v45  ;;  %v279_v51 = vand.u32 127, %v278_v48  ;;  %v1283_v55 = vshrl.u32 %v278_v48, 7  ;;  %s786_s9 = sshll.u32 %s1079_s16, 11 }
  0x3b   : > { %v1200_v9 = vld [vmem:[%s1168_s11 + $0x18] sm:$0xff]  ;;  %212 = vadd.xlane.f32.xlu1 %v211_v3  ;;  %v214_v10 = vadd.f32 %v1192_v6, %v1189_v5  ;;  %v1214_v15 = vld [vmem:[%s1168_s11 + $0x48] sm:$0xff]  ;;  %v1221_v18 = vld [vmem:[%s1168_s11 + $0x50] sm:$0xff]  ;;  %v246_v20 = vmax.f32 %v1189_v5, %v1192_v6  ;;  %vm303_vm3 = vcmask 261312   ;;  %vm310_vm4 = vcmask 326912   ;;  %s693_s7 = sshll.u32 %s1319_s6, 4  ;;  %s1350_s19 = scalar_lea.hbm %s1403_s3, %s786_s9  ;;  %s1352_s7 = int_to_ptr.vmem [resolvable:$true] %s693_s7 }
  0x3c   : > { %206 = vadd.xlane.f32.xlu0 %v205_v7  ;;  %v208_v11 = vadd.f32 %v1200_v9, %v1197_v8  ;;  %v240_v12 = vmax.f32 %v1197_v8, %v1200_v9  ;;  %v217_v17 = vadd.f32 %v1214_v15, %v1211_v14  ;;  %v1224_v19 = vld [vmem:[%s1168_s11 + $0x58] sm:$0xff]  ;;  %v1231_v22 = vld [vmem:[%s1168_s11 + $0x60] sm:$0xff]  ;;  %v1234_v23 = vld [vmem:[%s1168_s11 + $0x68] sm:$0xff]  ;;  %v249_v24 = vmax.f32 %v1211_v14, %v1214_v15  ;;  %s680_s16 = scalar_lea.sflag [#allocation4], %s1162_s5  ;;  %s961_s20 = scalar_lea.vmem %s1352_s7, 2048 }
  0x3d   : > { %v220_v21 = vadd.f32 %v1224_v19, %v1221_v18  ;;  %v223_v25 = vadd.f32 %v1234_v23, %v1231_v22  ;;  %v1241_v26 = vld [vmem:[%s1168_s11 + $0x70] sm:$0xff]  ;;  %v1244_v27 = vld [vmem:[%s1168_s11 + $0x78] sm:$0xff]  ;;  %v252_v28 = vmax.f32 %v1221_v18, %v1224_v19  ;;  %v255_v31 = vmax.f32 %v1231_v22, %v1234_v23  ;;  %v261_v32 = vld [vmem:[%s1401_s1] sm:$0xff]  ;;  %p962_p6 = scmp.ne.s32.totalorder %s1352_s7, %s961_s20  ;;  %p1410_p11 = scmp.ne.s32.totalorder %s1407_s24, 0 }
  0x3e   : > { %v226_v29 = vadd.f32 %v1244_v27, %v1241_v26  ;;  %v258_v30 = vmax.f32 %v1241_v26, %v1244_v27  ;;  %v262_v33 = vld [vmem:[%s1401_s1 + $0x8] sm:$0xff]  ;;  %v263_v36 = vld [vmem:[%s1401_s1 + $0x10] sm:$0xff]  ;;  %v264_v37 = vld [vmem:[%s1401_s1 + $0x18] sm:$0xff]  ;;  %v284_v52 = vadd.s32 4294967288, %v279_v51  ;;  %v291_v59 = vadd.s32 4294967280, %v279_v51  ;;  %s1035_s22 = smov [#allocation5]  }
  0x3f   : > { %215 = vadd.xlane.f32.xlu1 %v214_v10  ;;  %v851_v34 = vpack.c.bf16 %v262_v33, %v261_v32  ;;  %v854_v38 = vpack.c.bf16 %v264_v37, %v263_v36  ;;  %v265_v39 = vld [vmem:[%s1401_s1 + $0x20] sm:$0xff]  ;;  %v266_v40 = vld [vmem:[%s1401_s1 + $0x28] sm:$0xff]  ;;  %v267_v42 = vld [vmem:[%s1401_s1 + $0x30] sm:$0xff]  ;;  %v282_v61 = vsub.s32 %v279_v51, %v1283_v55  ;;  %v298_v63 = vadd.s32 4294967272, %v279_v51  ;;  %p963_p12 = pnand %p962_p6, %p1410_p11  ;;  %s965_s26 = sshll.u32 %s1035_s22, 4  ;;  %s966_s26 = int_to_ptr.vmem [resolvable:$false] %s965_s26 }
  0x40   : > { %209 = vadd.xlane.f32.xlu0 %v208_v11  ;;  %v857_v41 = vpack.c.bf16 %v266_v40, %v265_v39  ;;  %v268_v43 = vld [vmem:[%s1401_s1 + $0x38] sm:$0xff]  ;;  %v287_v56 = vsub.s32 %v284_v52, %v1283_v55  ;;  %v305_v3 = vadd.s32 4294967264, %v279_v51  ;;  %v312_v11 = vadd.s32 4294967256, %v279_v51  ;;  %s967_s27 = scalar_lea.vmem %s966_s26, 4096  ;;  %p968_p8 = scmp.lt.s32.totalorder %s1352_s7, %s966_s26 }
  0x41   : > { %852 = vmatpush3.bf16.msra.mxu0 %v851_v34  ;;  %864 = vmatpush3.bf16.msra.mxu1 %v851_v34  ;;  %v860_v44 = vpack.c.bf16 %v268_v43, %v267_v42  ;;  %v326_v33 = vadd.s32 4294967240, %v279_v51  ;;  %vm317_vm5 = vcmask 392512   ;;  %vm324_vm6 = vcmask 458112   ;;  %p964_p13 = pneg %p963_p12  ;;  %p969_p10 = scmp.lt.s32.totalorder %s967_s27, %s961_s20 }
  0x42   : > { %853 = vmatprep.subr.bf16.mxu0 %v1032_v35  ;;  %865 = vmatprep.subr.bf16.mxu1 %v1032_v35  ;;  %vm331_vm7 = vcmask 523712   ;;  %vm333_vm8 = vcmask 523264   ;;  %vm532_vm9 = vcmask 1043456   ;;  %vm528_vm10 = vcmask 31744  }
  0x43   : > { %241 = vmax.xlane.f32.xlu1 %v240_v12  ;;  %v294_v12 = vsub.s32 %v291_v59, %v1283_v55  ;;  %p970_p0 = por %p969_p10, %p968_p8 }
  0x44   : > { %238 = vmax.xlane.f32.xlu0 %v237_v13 }
  0x45   : > { %855 = vmatpush3.bf16.msra.mxu0 %v854_v38  ;;  %867 = vmatpush3.bf16.msra.mxu1 %v854_v38  ;;  %p971_p2 = pnand %p970_p0, %p964_p13 }
  0x46   : > { %856 = vmatprep.subr.bf16.mxu0 %v1032_v35  ;;  %868 = vmatprep.subr.bf16.mxu1 %v1032_v35 }
  0x47   : > { %244 = vmax.xlane.f32.xlu1 %v243_v16 }
  0x48   : > { %218 = vadd.xlane.f32.xlu0 %v217_v17  ;;  %v319_v17 = vadd.s32 4294967248, %v279_v51 }
  0x49   : > { %858 = vmatpush3.bf16.msra.mxu0 %v857_v41  ;;  %870 = vmatpush3.bf16.msra.mxu1 %v857_v41 }
  0x4a   : > { %859 = vmatprep.subr.bf16.mxu0 %v1032_v35  ;;  %871 = vmatprep.subr.bf16.mxu1 %v1032_v35  ;;  %v322_v35 = vsub.s32 %v319_v17, %v1283_v55 }
  0x4b   : > { %247 = vmax.xlane.f32.xlu1 %v246_v20 }
  0x4c   : > { %221 = vadd.xlane.f32.xlu0 %v220_v21  ;;  %v301_v21 = vsub.s32 %v298_v63, %v1283_v55 }
  0x4d   : > { %861 = vmatpush3.bf16.msra.mxu0 %v860_v44  ;;  %873 = vmatpush3.bf16.msra.mxu1 %v860_v44 }
  0x4e   : > { %845 = vmatprep.subr.mxu0 %v1034_v45 }
  0x4f   : > { %250 = vmax.xlane.f32.xlu1 %v249_v24 }
  0x50   : > { %224 = vadd.xlane.f32.xlu0 %v223_v25  ;;  %v308_v25 = vsub.s32 %v305_v3, %v1283_v55 }
  0x53   : > { %253 = vmax.xlane.f32.xlu1 %v252_v28 }
  0x54   : > { %227 = vadd.xlane.f32.xlu0 %v226_v29 }
  0x57   : > { %259 = vmax.xlane.f32.xlu1 %v258_v30  ;;  %v315_v30 = vsub.s32 %v312_v11, %v1283_v55 }
  0x58   : > { %256 = vmax.xlane.f32.xlu0 %v255_v31 }
  0xc8   : > { %v213_v46 = vpop.xlane.xlu1 %212 }
  0xc9   : > { %v207_v47 = vpop.xlane.xlu0 %206  ;;  %v231_v13 = vmul.f32 0.00390625, %v213_v46 }
  0xca   : > { %v229_v62 = vmul.f32 0.00390625, %v207_v47  ;;  %v329_v47 = vsub.s32 %v326_v33, %v1283_v55 }
  0xcb   : > { %v295_v34 = vrot.slane %v231_v13, %v294_v12 }
  0xcc   : > { %v216_v49 = vpop.xlane.xlu1 %215  ;;  %v283_v20 = vrot.slane %v229_v62, %v282_v61 }
  0xcd   : > { %v210_v50 = vpop.xlane.xlu0 %209  ;;  %v232_v24 = vmul.f32 0.00390625, %v216_v49 }
  0xce   : > { %v230_v57 = vmul.f32 0.00390625, %v210_v50 }
  0xcf   : > { %v302_v37 = vrot.slane %v232_v24, %v301_v21 }
  0xd0   : > { %v242_v53 = vpop.xlane.xlu1 %241  ;;  %v288_v7 = vrot.slane %v230_v57, %v287_v56 }
  0xd1   : > { %v239_v54 = vpop.xlane.xlu0 %238  ;;  %v422_v39 = vrot.slane %v242_v53, %v287_v56 }
  0xd2   : > { %v290_v29 = vsel %vm289_vm1, %v288_v7, %v283_v20  ;;  %v418_v40 = vrot.slane %v239_v54, %v282_v61  ;;  %v269_v20 = vld [vmem:[%s1402_s2] sm:$0xf] }
  0xd3   : > { %v297_v41 = vsel %vm296_vm2, %v295_v34, %v290_v29 }
  0xd4   : > { %v245_v58 = vpop.xlane.xlu1 %244  ;;  %v304_v51 = vsel %vm303_vm3, %v302_v37, %v297_v41  ;;  %v423_v53 = vsel %vm289_vm1, %v422_v39, %v418_v40 }
  0xd5   : > { %v219_v60 = vpop.xlane.xlu0 %218  ;;  %v427_v43 = vrot.slane %v245_v58, %v294_v12 }
  0xd6   : > { %v233_v28 = vmul.f32 0.00390625, %v219_v60 }
  0xd7   : > { %v428_v58 = vsel %vm296_vm2, %v427_v43, %v423_v53 }
  0xd8   : > { %v248_v10 = vpop.xlane.xlu1 %247  ;;  %v309_v42 = vrot.slane %v233_v28, %v308_v25 }
  0xd9   : > { %v222_v16 = vpop.xlane.xlu0 %221  ;;  %v432_v48 = vrot.slane %v248_v10, %v301_v21 }
  0xda   : > { %v234_v31 = vmul.f32 0.00390625, %v222_v16  ;;  %v311_v54 = vsel %vm310_vm4, %v309_v42, %v304_v51 }
  0xdb   : > { %v433_v62 = vsel %vm303_vm3, %v432_v48, %v428_v58 }
  0xdc   : > { %v251_v32 = vpop.xlane.xlu1 %250  ;;  %v316_v44 = vrot.slane %v234_v31, %v315_v30 }
  0xdd   : > { %v225_v36 = vpop.xlane.xlu0 %224  ;;  %v437_v52 = vrot.slane %v251_v32, %v308_v25 }
  0xde   : > { %v235_v38 = vmul.f32 0.00390625, %v225_v36  ;;  %v318_v59 = vsel %vm317_vm5, %v316_v44, %v311_v54  ;;  %v614_v36 = vsub.s32 0, %v1283_v55 }
  0xdf   : > { %v438_v10 = vsel %vm310_vm4, %v437_v52, %v433_v62 }
  0xe0   : > { %v254_v46 = vpop.xlane.xlu1 %253  ;;  %v323_v49 = vrot.slane %v235_v38, %v322_v35 }
  0xe1   : > { %v228_v50 = vpop.xlane.xlu0 %227  ;;  %v442_v56 = vrot.slane %v254_v46, %v315_v30 }
  0xe2   : > { %v236_v57 = vmul.f32 0.00390625, %v228_v50  ;;  %v325_v7 = vsel %vm324_vm6, %v323_v49, %v318_v59 }
  0xe3   : > { %v443_v13 = vsel %vm317_vm5, %v442_v56, %v438_v10 }
  0xe4   : > { %v330_v60 = vrot.slane %v236_v57, %v329_v47  ;;  %v260_v61 = vpop.xlane.xlu1 %259 }
  0xe5   : > { %v257_v63 = vpop.xlane.xlu0 %256  ;;  %v452_v3 = vrot.slane %v260_v61, %v329_v47 }
  0xe6   : > { %v447_v11 = vrot.slane %v257_v63, %v322_v35  ;;  %v332_v12 = vsel %vm331_vm7, %v330_v60, %v325_v7 }
  0xe7   : > { %824 = vmatmul.mubr.msk.f32.vlgmr.msra.gmra.mrb[0].mxu0 %vm333_vm8, %v332_v12 }
  0xe8   : > { %v448_v16 = vsel %vm324_vm6, %v447_v11, %v443_v13  ;;  %847 = vmatprep.mubr.msk.f32.mxu0 %vm1033_vm0, %v1034_v45  ;;  %846 = vmatpush3.msk.msra.mxu0 %vm532_vm9, %v269_v20 }
  0xe9   : > { %v453_v17 = vsel %vm331_vm7, %v452_v3, %v448_v16 }
  0xea   : > { %843 = vmatmul.mubr.msk.f32.vlgmr.msra.gmra.mrb[0].mxu1 %vm333_vm8, %v453_v17 }
 0x1ba   : > { %v402_v21 = vpop.f32.mrb[0].mxu0 }
 0x1bb   : > { %v825_v24 = vpop.f32.mrb[1].mxu0  ;;  %v406_v28 = vmax.f32 %v402_v21, 0.0 }
 0x1bd   : > { %v522_v25 = vpop.f32.mrb[0].mxu1 }
 0x1be   : > { %v526_v29 = vmax.f32 %v522_v25, 0.0  ;;  %v844_v30 = vpop.f32.mrb[1].mxu1 }
 0x1c0   : > { %v527_v31 = vadd.f32 %v526_v29, %v406_v28 }
 0x1c2   : > { %848 = vmatmul.mubr.msk.f32.vlgmr.msra.gmra.mrb[2].mxu0 %vm528_vm10, %v527_v31 }
 0x295   : > { %v602_v32 = vpop.f32.mrb[2].mxu0 }
 0x296   : > { %v779_v45 = vmul.f32 -1.442695, %v602_v32  ;;  %v849_v33 = vpop.f32.mrb[3].mxu0 }
 0x298   : > { %927 = vpow2.f32 %v779_v45 }
 0x2a2   : > { %v928_v34 = vpop.eup %927 }
 0x2a3   : > { %v609_v35 = vadd.f32 1.0, %v928_v34 }
 0x2a5   : > { %929 = vrcp.f32 %v609_v35 }
 0x2af   : > { %v930_v37 = vpop.eup %929 }
 0x2b0   : > { %v615_v38 = vrot.slane %v930_v37, %v614_v36 }
 0x2b2   : > { %621 = vbcast.lane.b32.xlu1 %v615_v38, 264  ;;  %617 = vbcast.lane.b32.xlu0 %v615_v38, 256 }
 0x2b6   : > { %625 = vbcast.lane.b32.xlu1 %v615_v38, 272  ;;  %633 = vbcast.lane.b32.xlu0 %v615_v38, 288 }
 0x2ba   : > { %629 = vbcast.lane.b32.xlu1 %v615_v38, 280  ;;  %641 = vbcast.lane.b32.xlu0 %v615_v38, 304 }
 0x2be   : > { %637 = vbcast.lane.b32.xlu1 %v615_v38, 296 }
 0x2c2   : > { %645 = vbcast.lane.b32.xlu1 %v615_v38, 312 }
 0x324   : > { %v622_v39 = vpop.permute.xlu1 %621  ;;  %v618_v40 = vpop.permute.xlu0 %617 }
 0x325   : > { %v649_v41 = vmul.f32 %v622_v39, %v1197_v8  ;;  %v650_v42 = vmul.f32 %v622_v39, %v1200_v9  ;;  %v647_v43 = vmul.f32 %v618_v40, %v1181_v2  ;;  %v648_v55 = vmul.f32 %v618_v40, %v1186_v4 }
 0x327   : > { %665 = vst [vmem:[%s1319_s6 + $0x10] sm:$0xff] %v649_v41  ;;  %666 = vst [vmem:[%s1319_s6 + $0x18] sm:$0xff] %v650_v42 }
 0x328   : > { %663 = vst [vmem:[%s1319_s6] sm:$0xff] %v647_v43  ;;  %664 = vst [vmem:[%s1319_s6 + $0x8] sm:$0xff] %v648_v55  ;;  %v626_v8 = vpop.permute.xlu1 %625  ;;  %v634_v2 = vpop.permute.xlu0 %633 }
 0x329   : > { %v651_v4 = vmul.f32 %v626_v8, %v1175_v0  ;;  %v652_v9 = vmul.f32 %v626_v8, %v1178_v1  ;;  %v655_v44 = vmul.f32 %v634_v2, %v1211_v14  ;;  %v656_v46 = vmul.f32 %v634_v2, %v1214_v15 }
 0x32b   : > { %667 = vst [vmem:[%s1319_s6 + $0x20] sm:$0xff] %v651_v4  ;;  %668 = vst [vmem:[%s1319_s6 + $0x28] sm:$0xff] %v652_v9 }
 0x32c   : > { %671 = vst [vmem:[%s1319_s6 + $0x40] sm:$0xff] %v655_v44  ;;  %672 = vst [vmem:[%s1319_s6 + $0x48] sm:$0xff] %v656_v46  ;;  %v630_v47 = vpop.permute.xlu1 %629  ;;  %v642_v48 = vpop.permute.xlu0 %641 }
 0x32d   : > { %v653_v0 = vmul.f32 %v630_v47, %v1189_v5  ;;  %v654_v49 = vmul.f32 %v630_v47, %v1192_v6  ;;  %v659_v1 = vmul.f32 %v642_v48, %v1231_v22  ;;  %v660_v14 = vmul.f32 %v642_v48, %v1234_v23 }
 0x32f   : > { %669 = vst [vmem:[%s1319_s6 + $0x30] sm:$0xff] %v653_v0  ;;  %670 = vst [vmem:[%s1319_s6 + $0x38] sm:$0xff] %v654_v49 }
 0x330   : > { %675 = vst [vmem:[%s1319_s6 + $0x60] sm:$0xff] %v659_v1  ;;  %676 = vst [vmem:[%s1319_s6 + $0x68] sm:$0xff] %v660_v14  ;;  %v638_v15 = vpop.permute.xlu1 %637 }
 0x331   : > { %v657_v50 = vmul.f32 %v638_v15, %v1221_v18  ;;  %v658_v51 = vmul.f32 %v638_v15, %v1224_v19 }
 0x333   : > { %673 = vst [vmem:[%s1319_s6 + $0x50] sm:$0xff] %v657_v50  ;;  %674 = vst [vmem:[%s1319_s6 + $0x58] sm:$0xff] %v658_v51 }
 0x334   : > { %v646_v5 = vpop.permute.xlu1 %645 }
 0x335   : > { %v661_v6 = vmul.f32 %v646_v5, %v1241_v26  ;;  %v662_v18 = vmul.f32 %v646_v5, %v1244_v27 }
 0x337   : > { %677 = vst [vmem:[%s1319_s6 + $0x70] sm:$0xff] %v661_v6  ;;  %678 = vst [vmem:[%s1319_s6 + $0x78] sm:$0xff] %v662_v18 }
 0x338   : > { %974 = shalt.err (!%p971_p2)
}
 0x339   : > { %s975_s28 = scalar_lea.hbm %s1350_s19, 2048  ;;  %s979_s10 = scalar_lea.hbm %s1403_s3, 4096 }
 0x33a   : > { %p976_p4 = scmp.ne.s32.totalorder %s1350_s19, %s975_s28  ;;  %p980_p9 = scmp.lt.u32.totalorder %s1350_s19, %s1403_s3 }
 0x33b   : > { %p981_p1 = scmp.lt.u32.totalorder %s979_s10, %s975_s28  ;;  %p983_p6 = scmp.lt.u32.totalorder %s975_s28, %s1350_s19 }
 0x33c   : > { %p977_p5 = pnand %p976_p4, %p1410_p11 }
 0x33d   : > { %p982_p3 = por %p981_p1, %p980_p9 }
 0x33e   : > { %p978_p7 = pneg %p977_p5 }
 0x33f   : > { %p984_p12 = por %p983_p6, %p982_p3 }
 0x341   : > { %p985_p13 = pnand %p984_p12, %p978_p7 }
 0x343   : > { %988 = shalt.err (!%p985_p13)
}
 0x344   : > { %s1036_s4 = smov 256   ;;  %s1037_s6 = smov 16  }
 0x345   : > { %876 = dma.vmem_to_hbm [thread:$0]  (%p1410_p11), %s1352_s7, 2048, %s1350_s19, %s680_s16, %s1036_s4, %s1036_s4, %s1037_s6  }
 0x346 PF: > { %s708_s9 = sand.u32 1, %s1015_s12   ;;  %p1411_p8 = scmp.ne.s32.totalorder %s1408_s25, 0 }
 0x347   : > { %p1412_p10 = scmp.ge.s32.totalorder %s1027_s15, 2  ;;  %s709_s8 = scalar_lea.sflag [#allocation4], %s708_s9 }
 0x349   : > { %p883_p0 = pnand %p1412_p10, %p1411_p8 }
 0x34b   : > { %1010 = dma.done.wait (!%p883_p0), %s709_s8, 2048  }
 0x34c   : > { %1012 = vsyncadd (!%p883_p0), %s709_s8, 4294965248  ;;  %p16_p2 = scmp.ge.s32.totalorder %s1083_s18, 4   ;;  %s1413_s12 = smov %s1019_s13 }
 0x34d   : > { %s1414_s13 = smov %s1023_s14  ;;  %s1415_s14 = smov %s1095_s21 }
 0x34e   : > { %s1416_s15 = smov %s1083_s18  ;;  %18 = sbr.rel (!%p16_p2) target bundleno = 5 (0x5), region = 77 }
 0x355   :  { %714 = vsyncpa [#allocation3], 1 }
 0x356   :  { %716 = vsyncpa [#allocation3 + $0x1], 1 }
 0x357   :  { %717 = vsyncpa [#allocation4], 1 }
 0x358   :  { %719 = vsyncpa [#allocation4 + $0x1], 1 }

</bundles_post_ra>
